<compile_context>
chip_gen: v7x
topology: tpu7x:2x2x1
jax: 0.10.0
libtpu: 0.0.40
codegen_flags: <defaults>
</compile_context>

<pallas_src>
import functools

import jax
import jax.numpy as jnp
from jax.experimental import pallas as pl
from jax.experimental.pallas import tpu as pltpu

IN_DIM = 196      # 14 * 14
HID = 128
LAT = 8


def vae_kernel(x_ref, e1_ref, e2_ref,
               w1_ref, b1_ref,
               wms_ref, bms_ref,
               w3_ref, b3_ref,
               w4_ref, b4_ref,
               recon_ref, mu_ref, std_ref):
    bf16, f32 = jnp.bfloat16, jnp.float32

    x = x_ref[...].astype(bf16)                                    # (tb, 196)

    # ---- encoder ----
    h = jnp.tanh(jnp.dot(x, w1_ref[...], preferred_element_type=f32)
                 + b1_ref[...])                                    # (tb, 128) f32
    ms = (jnp.dot(h.astype(bf16), wms_ref[...], preferred_element_type=f32)
          + bms_ref[...])                                          # (tb, 16) = [mu | std]
    mu = ms[:, :LAT]
    std = ms[:, LAT:]

    # ---- sampling:  0.5*(e1*s + m + (e2*s + m)) == 0.5*(e1+e2)*s + m ----
    z = 0.5 * (e1_ref[...] + e2_ref[...]) * std + mu               # (tb, 8) f32

    # ---- decoder ----
    h3 = jnp.tanh(jnp.dot(z.astype(bf16), w3_ref[...], preferred_element_type=f32)
                  + b3_ref[...])                                   # (tb, 128) f32
    logits = (jnp.dot(h3.astype(bf16), w4_ref[...], preferred_element_type=f32)
              + b4_ref[...])                                       # (tb, 196) f32

    recon_ref[...] = jax.nn.sigmoid(logits)
    mu_ref[...] = mu
    std_ref[...] = std


def init_params(key):
    """Deterministic PyTorch-nn.Linear-style init: U(-1/sqrt(fan_in), +)."""
    def linear(key, fan_in, fan_out):
        kw, kb = jax.random.split(key)
        bound = 1.0 / jnp.sqrt(jnp.float32(fan_in))
        # stored transposed: (in, out), so y = x @ W + b == torch x @ W.T + b
        w = jax.random.uniform(kw, (fan_in, fan_out), jnp.float32,
                               minval=-bound, maxval=bound)
        b = jax.random.uniform(kb, (1, fan_out), jnp.float32,
                               minval=-bound, maxval=bound)
        return w, b

    keys = jax.random.split(key, 5)
    w1, b1 = linear(keys[0], IN_DIM, HID)
    w21, b21 = linear(keys[1], HID, LAT)
    w22, b22 = linear(keys[2], HID, LAT)
    w3, b3 = linear(keys[3], LAT, HID)
    w4, b4 = linear(keys[4], HID, IN_DIM)
    return (w1, b1, w21, b21, w22, b22, w3, b3, w4, b4)


def pack_params(params):
    """One-time packing (call OUTSIDE the per-step jit): fuse fc21/fc22 and
    cast matmul weights to bf16; biases stay f32 (added post-accumulation)."""
    (w1, b1, w21, b21, w22, b22, w3, b3, w4, b4) = params
    bf16 = jnp.bfloat16
    w1p = w1.astype(bf16)                                   # (196, 128)
    wms = jnp.concatenate([w21, w22], axis=1).astype(bf16)  # (128, 16)
    bms = jnp.concatenate([b21, b22], axis=1)               # (1, 16) f32
    w3p = w3.astype(bf16)                                   # (8, 128)
    w4p = w4.astype(bf16)                                   # (128, 196)
    return (w1p, b1, wms, bms, w3p, b3, w4p, b4)


def _round_up(n, m):
    return -(-n // m) * m


def _choose_tb(batch, tile_b):
    """Batch tile: multiple of 8, >=2 grid steps when possible (v7x megacore),
    and preferentially a divisor of the 8-rounded batch (no padding copies)."""
    b8 = _round_up(batch, 8)
    if b8 <= 8:
        return 8
    cap = max(8, min(_round_up(tile_b, 8), _round_up(-(-b8 // 2), 8)))
    t = cap
    while t >= 8:
        if b8 % t == 0 and 4 * t >= cap:
            return t
        t -= 8
    return cap


@functools.partial(jax.jit, static_argnames=("tile_b",))
def vae_forward(x, packed_params, eps1, eps2, tile_b=2048):
    B = x.shape[0]
    xf = x.reshape(B, IN_DIM)                   # torch: x.view(-1, 196) (free)
    if xf.dtype != jnp.float32:
        xf = xf.astype(jnp.float32)
    eps1 = eps1.astype(jnp.float32)
    eps2 = eps2.astype(jnp.float32)

    tb = _choose_tb(B, tile_b)
    Bp = _round_up(B, tb)
    grid = (Bp // tb,)

    # pad the batch only when strictly necessary (tb usually divides B)
    if Bp != B:
        xf = jnp.zeros((Bp, IN_DIM), jnp.float32).at[:B].set(xf)
        eps1 = jnp.zeros((Bp, LAT), jnp.float32).at[:B].set(eps1)
        eps2 = jnp.zeros((Bp, LAT), jnp.float32).at[:B].set(eps2)

    w1, b1, wms, bms, w3, b3, w4, b4 = packed_params

    def batch_spec(n):
        return pl.BlockSpec((tb, n), lambda i: (i, 0))

    def const_spec(r, c):
        return pl.BlockSpec((r, c), lambda i: (0, 0))   # resident across grid

    recon, mu, std = pl.pallas_call(
        vae_kernel,
        out_shape=(jax.ShapeDtypeStruct((Bp, IN_DIM), jnp.float32),
                   jax.ShapeDtypeStruct((Bp, LAT), jnp.float32),
                   jax.ShapeDtypeStruct((Bp, LAT), jnp.float32)),
        grid_spec=pltpu.PrefetchScalarGridSpec(
            num_scalar_prefetch=0,
            grid=grid,
            in_specs=[
                batch_spec(IN_DIM),            # x (B, 196) f32, natural layout
                batch_spec(LAT),               # eps1
                batch_spec(LAT),               # eps2
                const_spec(IN_DIM, HID),       # w1 (196, 128) bf16
                const_spec(1, HID),            # b1
                const_spec(HID, 2 * LAT),      # [w21 | w22] (128, 16) bf16
                const_spec(1, 2 * LAT),        # [b21 | b22]
                const_spec(LAT, HID),          # w3 (8, 128) bf16
                const_spec(1, HID),            # b3
                const_spec(HID, IN_DIM),       # w4 (128, 196) bf16
                const_spec(1, IN_DIM),         # b4
            ],
            out_specs=(batch_spec(IN_DIM),     # recon (B, 196) f32
                       batch_spec(LAT),        # mu    (B, 8)
                       batch_spec(LAT)),       # std   (B, 8)
        ),
        compiler_params=pltpu.CompilerParams(
            dimension_semantics=("parallel",),
            vmem_limit_bytes=48 * 1024 * 1024),
    )(xf, eps1, eps2, w1, b1, wms, bms, w3, b3, w4, b4)

    if Bp != B:
        recon, mu, std = recon[:B], mu[:B], std[:B]
    return recon, mu, std


def vae_forward_ref(x, params, eps1, eps2):
    """Pure-JAX reference with the same bf16-weights / f32-accumulate recipe."""
    (w1, b1, w21, b21, w22, b22, w3, b3, w4, b4) = params
    B = x.shape[0]
    xf = x.reshape(B, IN_DIM).astype(jnp.float32)
    bf16, f32 = jnp.bfloat16, jnp.float32

    def dot(a, w):
        return jnp.dot(a.astype(bf16), w.astype(bf16), preferred_element_type=f32)

    h = jnp.tanh(dot(xf, w1) + b1)
    mu = dot(h, w21) + b21
    std = dot(h, w22) + b22
    z = 0.5 * (eps1 * std + mu + (eps2 * std + mu))   # original torch expression
    h3 = jnp.tanh(dot(z, w3) + b3)
    recon = jax.nn.sigmoid(dot(h3, w4) + b4)
    return recon, mu, std


if __name__ == "__main__":
    key = jax.random.PRNGKey(0)
    k_x, k_p, k_e1, k_e2 = jax.random.split(key, 4)

    B = 8
    x = jax.random.normal(k_x, (B, 1, 14, 14), jnp.float32)   # NCHW, 14*14 = 196
    params = init_params(k_p)
    packed = pack_params(params)                               # hoisted, once
    # eps ~ N(0, 1): plays the role of torch.randn_like(std) in sampling()
    eps1 = jax.random.normal(k_e1, (B, LAT), jnp.float32)
    eps2 = jax.random.normal(k_e2, (B, LAT), jnp.float32)

    recon, mu, std = jax.block_until_ready(vae_forward(x, packed, eps1, eps2))

    # correctness check against pure-JAX reference (same mixed-precision recipe)
    recon_r, mu_r, std_r = vae_forward_ref(x, params, eps1, eps2)
    assert recon.shape == (B, IN_DIM) and mu.shape == (B, LAT) and std.shape == (B, LAT)
    assert jnp.allclose(recon, recon_r, atol=2e-3, rtol=2e-3)
    assert jnp.allclose(mu, mu_r, atol=2e-3, rtol=2e-3)
    assert jnp.allclose(std, std_r, atol=2e-3, rtol=2e-3)

    print("KERNEL_OK")
</pallas_src>

<mosaic_0001>
module attributes {stable_mosaic.version = 11 : i64} {
  func.func @vae_kernel(%arg0: i32, %arg1: memref<8x196xf32, #tpu.memory_space<vmem>>, %arg2: memref<8x8xf32, #tpu.memory_space<vmem>>, %arg3: memref<8x8xf32, #tpu.memory_space<vmem>>, %arg4: memref<196x128xbf16, #tpu.memory_space<vmem>>, %arg5: memref<1x128xf32, #tpu.memory_space<vmem>>, %arg6: memref<128x16xbf16, #tpu.memory_space<vmem>>, %arg7: memref<1x16xf32, #tpu.memory_space<vmem>>, %arg8: memref<8x128xbf16, #tpu.memory_space<vmem>>, %arg9: memref<1x128xf32, #tpu.memory_space<vmem>>, %arg10: memref<128x196xbf16, #tpu.memory_space<vmem>>, %arg11: memref<1x196xf32, #tpu.memory_space<vmem>>, %arg12: memref<8x196xf32, #tpu.memory_space<vmem>>, %arg13: memref<8x8xf32, #tpu.memory_space<vmem>>, %arg14: memref<8x8xf32, #tpu.memory_space<vmem>>) attributes {dimension_semantics = [#tpu.dimension_semantics<parallel>], iteration_bounds = array<i64: 1>, scalar_prefetch = 0 : i64, scratch_operands = 0 : i64, tpu.core_type = #tpu.core_type<tc>, window_params = [{transform_indices = @transform_0, window_bounds = array<i64: 8, 196>}, {transform_indices = @transform_1, window_bounds = array<i64: 8, 8>}, {transform_indices = @transform_2, window_bounds = array<i64: 8, 8>}, {pipeline_mode = #tpu.pipeline_mode<synchronous>, transform_indices = @transform_3, window_bounds = array<i64: 196, 128>}, {pipeline_mode = #tpu.pipeline_mode<synchronous>, transform_indices = @transform_4, window_bounds = array<i64: 1, 128>}, {pipeline_mode = #tpu.pipeline_mode<synchronous>, transform_indices = @transform_5, window_bounds = array<i64: 128, 16>}, {pipeline_mode = #tpu.pipeline_mode<synchronous>, transform_indices = @transform_6, window_bounds = array<i64: 1, 16>}, {pipeline_mode = #tpu.pipeline_mode<synchronous>, transform_indices = @transform_7, window_bounds = array<i64: 8, 128>}, {pipeline_mode = #tpu.pipeline_mode<synchronous>, transform_indices = @transform_8, window_bounds = array<i64: 1, 128>}, {pipeline_mode = #tpu.pipeline_mode<synchronous>, transform_indices = @transform_9, window_bounds = array<i64: 128, 196>}, {pipeline_mode = #tpu.pipeline_mode<synchronous>, transform_indices = @transform_10, window_bounds = array<i64: 1, 196>}, {transform_indices = @transform_11, window_bounds = array<i64: 8, 196>}, {transform_indices = @transform_12, window_bounds = array<i64: 8, 8>}, {transform_indices = @transform_13, window_bounds = array<i64: 8, 8>}]} {
    %c0 = arith.constant 0 : index
    %c0_0 = arith.constant 0 : index
    %0 = vector.load %arg1[%c0, %c0_0] : memref<8x196xf32, #tpu.memory_space<vmem>>, vector<8x196xf32>
    %1 = arith.truncf %0 : vector<8x196xf32> to vector<8x196xbf16>
    %c0_1 = arith.constant 0 : index
    %c0_2 = arith.constant 0 : index
    %2 = vector.load %arg4[%c0_1, %c0_2] : memref<196x128xbf16, #tpu.memory_space<vmem>>, vector<196x128xbf16>
    %cst = arith.constant dense<0.000000e+00> : vector<8x128xf32>
    %3 = tpu.matmul %1, %2, %cst {dimension_numbers = #tpu.dot_dimension_numbers<[1], [0], [0], [1], [0, 0, 1, 1], [], []>} : vector<8x196xbf16>, vector<196x128xbf16>, vector<8x128xf32> -> vector<8x128xf32>
    %c0_3 = arith.constant 0 : index
    %c0_4 = arith.constant 0 : index
    %4 = vector.load %arg5[%c0_3, %c0_4] : memref<1x128xf32, #tpu.memory_space<vmem>>, vector<1x128xf32>
    %5 = vector.broadcast %4 : vector<1x128xf32> to vector<8x128xf32>
    %6 = arith.addf %3, %5 : vector<8x128xf32>
    %7 = math.tanh %6 : vector<8x128xf32>
    %8 = arith.truncf %7 : vector<8x128xf32> to vector<8x128xbf16>
    %c0_5 = arith.constant 0 : index
    %c0_6 = arith.constant 0 : index
    %9 = vector.load %arg6[%c0_5, %c0_6] : memref<128x16xbf16, #tpu.memory_space<vmem>>, vector<128x16xbf16>
    %cst_7 = arith.constant dense<0.000000e+00> : vector<8x16xf32>
    %10 = tpu.matmul %8, %9, %cst_7 {dimension_numbers = #tpu.dot_dimension_numbers<[1], [0], [0], [1], [0, 0, 1, 1], [], []>} : vector<8x128xbf16>, vector<128x16xbf16>, vector<8x16xf32> -> vector<8x16xf32>
    %c0_8 = arith.constant 0 : index
    %c0_9 = arith.constant 0 : index
    %11 = vector.load %arg7[%c0_8, %c0_9] : memref<1x16xf32, #tpu.memory_space<vmem>>, vector<1x16xf32>
    %12 = vector.broadcast %11 : vector<1x16xf32> to vector<8x16xf32>
    %13 = arith.addf %10, %12 : vector<8x16xf32>
    %14 = vector.extract_strided_slice %13 {offsets = [0, 0], sizes = [8, 8], strides = [1, 1]} : vector<8x16xf32> to vector<8x8xf32>
    %15 = vector.extract_strided_slice %13 {offsets = [0, 8], sizes = [8, 8], strides = [1, 1]} : vector<8x16xf32> to vector<8x8xf32>
    %c0_10 = arith.constant 0 : index
    %c0_11 = arith.constant 0 : index
    %16 = vector.load %arg2[%c0_10, %c0_11] : memref<8x8xf32, #tpu.memory_space<vmem>>, vector<8x8xf32>
    %c0_12 = arith.constant 0 : index
    %c0_13 = arith.constant 0 : index
    %17 = vector.load %arg3[%c0_12, %c0_13] : memref<8x8xf32, #tpu.memory_space<vmem>>, vector<8x8xf32>
    %18 = arith.addf %16, %17 : vector<8x8xf32>
    %cst_14 = arith.constant 5.000000e-01 : f32
    %19 = vector.broadcast %cst_14 : f32 to vector<8x8xf32>
    %20 = arith.mulf %19, %18 : vector<8x8xf32>
    %21 = arith.mulf %20, %15 : vector<8x8xf32>
    %22 = arith.addf %21, %14 : vector<8x8xf32>
    %23 = arith.truncf %22 : vector<8x8xf32> to vector<8x8xbf16>
    %c0_15 = arith.constant 0 : index
    %c0_16 = arith.constant 0 : index
    %24 = vector.load %arg8[%c0_15, %c0_16] : memref<8x128xbf16, #tpu.memory_space<vmem>>, vector<8x128xbf16>
    %cst_17 = arith.constant dense<0.000000e+00> : vector<8x128xf32>
    %25 = tpu.matmul %23, %24, %cst_17 {dimension_numbers = #tpu.dot_dimension_numbers<[1], [0], [0], [1], [0, 0, 1, 1], [], []>} : vector<8x8xbf16>, vector<8x128xbf16>, vector<8x128xf32> -> vector<8x128xf32>
    %c0_18 = arith.constant 0 : index
    %c0_19 = arith.constant 0 : index
    %26 = vector.load %arg9[%c0_18, %c0_19] : memref<1x128xf32, #tpu.memory_space<vmem>>, vector<1x128xf32>
    %27 = vector.broadcast %26 : vector<1x128xf32> to vector<8x128xf32>
    %28 = arith.addf %25, %27 : vector<8x128xf32>
    %29 = math.tanh %28 : vector<8x128xf32>
    %30 = arith.truncf %29 : vector<8x128xf32> to vector<8x128xbf16>
    %c0_20 = arith.constant 0 : index
    %c0_21 = arith.constant 0 : index
    %31 = vector.load %arg10[%c0_20, %c0_21] : memref<128x196xbf16, #tpu.memory_space<vmem>>, vector<128x196xbf16>
    %cst_22 = arith.constant dense<0.000000e+00> : vector<8x196xf32>
    %32 = tpu.matmul %30, %31, %cst_22 {dimension_numbers = #tpu.dot_dimension_numbers<[1], [0], [0], [1], [0, 0, 1, 1], [], []>} : vector<8x128xbf16>, vector<128x196xbf16>, vector<8x196xf32> -> vector<8x196xf32>
    %c0_23 = arith.constant 0 : index
    %c0_24 = arith.constant 0 : index
    %33 = vector.load %arg11[%c0_23, %c0_24] : memref<1x196xf32, #tpu.memory_space<vmem>>, vector<1x196xf32>
    %34 = vector.broadcast %33 : vector<1x196xf32> to vector<8x196xf32>
    %35 = arith.addf %32, %34 : vector<8x196xf32>
    %36 = arith.negf %35 : vector<8x196xf32>
    %37 = math.exp %36 : vector<8x196xf32>
    %cst_25 = arith.constant 1.000000e+00 : f32
    %38 = vector.broadcast %cst_25 : f32 to vector<8x196xf32>
    %39 = arith.addf %38, %37 : vector<8x196xf32>
    %40 = arith.divf %38, %39 : vector<8x196xf32>
    %c0_26 = arith.constant 0 : index
    %c0_27 = arith.constant 0 : index
    %41 = vector.load %arg12[%c0_26, %c0_27] : memref<8x196xf32, #tpu.memory_space<vmem>>, vector<8x196xf32>
    tpu.vector_store %arg12[%c0_26, %c0_27], %40 {strides = array<i32>} : memref<8x196xf32, #tpu.memory_space<vmem>>, vector<8x196xf32>,
    %c0_28 = arith.constant 0 : index
    %c0_29 = arith.constant 0 : index
    %42 = vector.load %arg13[%c0_28, %c0_29] : memref<8x8xf32, #tpu.memory_space<vmem>>, vector<8x8xf32>
    tpu.vector_store %arg13[%c0_28, %c0_29], %14 {strides = array<i32>} : memref<8x8xf32, #tpu.memory_space<vmem>>, vector<8x8xf32>,
    %c0_30 = arith.constant 0 : index
    %c0_31 = arith.constant 0 : index
    %43 = vector.load %arg14[%c0_30, %c0_31] : memref<8x8xf32, #tpu.memory_space<vmem>>, vector<8x8xf32>
    tpu.vector_store %arg14[%c0_30, %c0_31], %15 {strides = array<i32>} : memref<8x8xf32, #tpu.memory_space<vmem>>, vector<8x8xf32>,
    return
  }
  func.func @transform_0(%arg0: i32) -> (i32, i32) {
    %c0_i32 = arith.constant 0 : i32
    %c0_i32_0 = arith.constant 0 : i32
    return %arg0, %c0_i32 : i32, i32
  }
  func.func @transform_1(%arg0: i32) -> (i32, i32) {
    %c0_i32 = arith.constant 0 : i32
    %c0_i32_0 = arith.constant 0 : i32
    return %arg0, %c0_i32 : i32, i32
  }
  func.func @transform_2(%arg0: i32) -> (i32, i32) {
    %c0_i32 = arith.constant 0 : i32
    %c0_i32_0 = arith.constant 0 : i32
    return %arg0, %c0_i32 : i32, i32
  }
  func.func @transform_3(%arg0: i32) -> (i32, i32) {
    %c0_i32 = arith.constant 0 : i32
    %c0_i32_0 = arith.constant 0 : i32
    %c0_i32_1 = arith.constant 0 : i32
    return %c0_i32, %c0_i32_0 : i32, i32
  }
  func.func @transform_4(%arg0: i32) -> (i32, i32) {
    %c0_i32 = arith.constant 0 : i32
    %c0_i32_0 = arith.constant 0 : i32
    %c0_i32_1 = arith.constant 0 : i32
    return %c0_i32, %c0_i32_0 : i32, i32
  }
  func.func @transform_5(%arg0: i32) -> (i32, i32) {
    %c0_i32 = arith.constant 0 : i32
    %c0_i32_0 = arith.constant 0 : i32
    %c0_i32_1 = arith.constant 0 : i32
    return %c0_i32, %c0_i32_0 : i32, i32
  }
  func.func @transform_6(%arg0: i32) -> (i32, i32) {
    %c0_i32 = arith.constant 0 : i32
    %c0_i32_0 = arith.constant 0 : i32
    %c0_i32_1 = arith.constant 0 : i32
    return %c0_i32, %c0_i32_0 : i32, i32
  }
  func.func @transform_7(%arg0: i32) -> (i32, i32) {
    %c0_i32 = arith.constant 0 : i32
    %c0_i32_0 = arith.constant 0 : i32
    %c0_i32_1 = arith.constant 0 : i32
    return %c0_i32, %c0_i32_0 : i32, i32
  }
  func.func @transform_8(%arg0: i32) -> (i32, i32) {
    %c0_i32 = arith.constant 0 : i32
    %c0_i32_0 = arith.constant 0 : i32
    %c0_i32_1 = arith.constant 0 : i32
    return %c0_i32, %c0_i32_0 : i32, i32
  }
  func.func @transform_9(%arg0: i32) -> (i32, i32) {
    %c0_i32 = arith.constant 0 : i32
    %c0_i32_0 = arith.constant 0 : i32
    %c0_i32_1 = arith.constant 0 : i32
    return %c0_i32, %c0_i32_0 : i32, i32
  }
  func.func @transform_10(%arg0: i32) -> (i32, i32) {
    %c0_i32 = arith.constant 0 : i32
    %c0_i32_0 = arith.constant 0 : i32
    %c0_i32_1 = arith.constant 0 : i32
    return %c0_i32, %c0_i32_0 : i32, i32
  }
  func.func @transform_11(%arg0: i32) -> (i32, i32) {
    %c0_i32 = arith.constant 0 : i32
    %c0_i32_0 = arith.constant 0 : i32
    return %arg0, %c0_i32 : i32, i32
  }
  func.func @transform_12(%arg0: i32) -> (i32, i32) {
    %c0_i32 = arith.constant 0 : i32
    %c0_i32_0 = arith.constant 0 : i32
    return %arg0, %c0_i32 : i32, i32
  }
  func.func @transform_13(%arg0: i32) -> (i32, i32) {
    %c0_i32 = arith.constant 0 : i32
    %c0_i32_0 = arith.constant 0 : i32
    return %arg0, %c0_i32 : i32, i32
  }
}

</mosaic_0001>

<bundles_post_ra>
// kernel: vae_forward.1
= control target key start
LH: loop header
LB: loop body
LE: loop exit
PB: predicated region body
PF: predicated region fallthrough
CT: control target
= control target key end

     0   :  { %19 = vsyncpa [#allocation3], 0  ;;  %v806_v1 = vmov 0   ;;  %v807_v3 = vmov 0.0   ;;  %vm155_vm0 = vcmask 556032   ;;  %s1087_s0 = inlined_call_operand.vmem [shape: f32[8,196], index: 0, kind: input, shape index: {}]   ;;  %s1088_s1 = inlined_call_operand.vmem [shape: f32[8,8], index: 1, kind: input, shape index: {}]   ;;  %s1089_s2 = inlined_call_operand.vmem [shape: f32[8,8], index: 2, kind: input, shape index: {}]   ;;  %s1090_s3 = inlined_call_operand.vmem [shape: bf16[196,128], index: 3, kind: input, shape index: {}]   ;;  %s1091_s4 = inlined_call_operand.vmem [shape: f32[1,128], index: 4, kind: input, shape index: {}]   ;;  %s1092_s5 = inlined_call_operand.vmem [shape: bf16[128,16], index: 5, kind: input, shape index: {}]   ;;  %s1093_s6 = inlined_call_operand.vmem [shape: f32[1,16], index: 6, kind: input, shape index: {}]   ;;  %s1094_s7 = inlined_call_operand.vmem [shape: bf16[8,128], index: 7, kind: input, shape index: {}]   ;;  %s1095_s8 = inlined_call_operand.vmem [shape: f32[1,128], index: 8, kind: input, shape index: {}]   ;;  %s1096_s9 = inlined_call_operand.vmem [shape: bf16[128,196], index: 9, kind: input, shape index: {}]   ;;  %s1097_s10 = inlined_call_operand.vmem [shape: f32[1,196], index: 10, kind: input, shape index: {}]   ;;  %s1098_s11 = inlined_call_operand.hbm [shape: f32[8,196], index: 11, kind: output, shape index: {0}]   ;;  %s1099_s12 = inlined_call_operand.hbm [shape: f32[8,8], index: 12, kind: output, shape index: {1}]   ;;  %s1100_s13 = inlined_call_operand.hbm [shape: f32[8,8], index: 13, kind: output, shape index: {2}]  }
   0x1   :  { %v679_v0 = vld [vmem:[%s1090_s3] sm:$0xff]   ;;  %163 = vmatprep.subr.bf16.mxu0 %v806_v1  ;;  %v680_v2 = vld [vmem:[%s1090_s3 + $0x8] sm:$0xff]   ;;  %646 = vmatprep.subr.bf16.mxu1 %v807_v3  ;;  %v681_v4 = vld [vmem:[%s1090_s3 + $0x10] sm:$0xff]  }
   0x2   :  { %164 = vmatpush1.bf16.msra.mxu0 %v679_v0  ;;  %v682_v5 = vld [vmem:[%s1090_s3 + $0x18] sm:$0xff]   ;;  %v45_v6 = vld [vmem:[%s1087_s0 + $0x8] sm:$0xff]  ;;  %v683_v7 = vld [vmem:[%s1090_s3 + $0x20] sm:$0xff]  }
   0x3   :  { %165 = vmatprep.subr.bf16.mxu0 %v806_v1  ;;  %v47_v8 = vpack.c.bf16 %v45_v6, %v45_v6  ;;  %v692_v9 = vld [vmem:[%s1092_s5] sm:$0xff]   ;;  %v693_v10 = vld [vmem:[%s1092_s5 + $0x8] sm:$0xff]   ;;  %v694_v12 = vld [vmem:[%s1092_s5 + $0x10] sm:$0xff]  }
   0x4   :  { %647 = vmatpush3.bf16.msra.mxu1 %v692_v9  ;;  %v684_v11 = vld [vmem:[%s1090_s3 + $0x28] sm:$0xff]   ;;  %v685_v13 = vld [vmem:[%s1090_s3 + $0x30] sm:$0xff]   ;;  %v695_v14 = vld [vmem:[%s1092_s5 + $0x18] sm:$0xff]  }
   0x5   :  { %605 = vmatprep.mubr.msk.bf16.mxu0 %vm155_vm0, %v47_v8  ;;  %648 = vmatprep.subr.bf16.mxu1 %v807_v3 }
   0x6   :  { %166 = vmatpush1.bf16.msra.mxu0 %v680_v2 }
   0x7   :  { %167 = vmatprep.subr.bf16.mxu0 %v806_v1 }
   0x8   :  { %649 = vmatpush3.bf16.msra.mxu1 %v693_v10 }
   0x9   :  { %650 = vmatprep.subr.bf16.mxu1 %v807_v3 }
   0xa   :  { %168 = vmatpush1.bf16.msra.mxu0 %v681_v4 }
   0xb   :  { %169 = vmatprep.subr.bf16.mxu0 %v806_v1 }
   0xc   :  { %651 = vmatpush3.bf16.msra.mxu1 %v694_v12 }
   0xd   :  { %652 = vmatprep.subr.bf16.mxu1 %v807_v3 }
   0xe   :  { %170 = vmatpush1.bf16.msra.mxu0 %v682_v5 }
   0xf   :  { %171 = vmatprep.subr.bf16.mxu0 %v806_v1 }
  0x12   :  { %172 = vmatpush1.bf16.msra.mxu0 %v683_v7 }
  0x13   :  { %173 = vmatprep.subr.bf16.mxu0 %v806_v1 }
  0x16   :  { %174 = vmatpush1.bf16.msra.mxu0 %v684_v11 }
  0x17   :  { %175 = vmatprep.subr.bf16.mxu0 %v806_v1 }
  0x18   :  { %20 = vsyncpa [#allocation5], 0  ;;  %v686_v15 = vld [vmem:[%s1090_s3 + $0x38] sm:$0xff]   ;;  %653 = vmatpush3.bf16.msra.mxu1 %v695_v14  ;;  %v687_v16 = vld [vmem:[%s1090_s3 + $0x40] sm:$0xff]   ;;  %vm159_vm1 = vcmask 1041408   ;;  %vm808_vm2 = vmmov 0  }
  0x19   :  { %654 = vmatprep.subr.bf16.mxu1 %v807_v3  ;;  %v688_v17 = vld [vmem:[%s1090_s3 + $0x48] sm:$0xff]   ;;  %v689_v18 = vld [vmem:[%s1090_s3 + $0x50] sm:$0xff]   ;;  %v690_v19 = vld [vmem:[%s1090_s3 + $0x58] sm:$0xff]   ;;  %662 = vmatprep.mubr.msk.bf16.mxu1 %vm808_vm2, %v807_v3  ;;  %vm339_vm3 = vcmask 1043456   ;;  %vm335_vm4 = vcmask 64512   ;;  %s810_s15 = smov [#allocation4]  }
  0x1a   :  { %176 = vmatpush1.bf16.msra.mxu0 %v685_v13  ;;  %v691_v20 = vld [vmem:[%s1090_s3 + $0x60] ss:$0 sps:$4 sm:$0x33]   ;;  %v697_v25 = vld [vmem:[%s1092_s5 + $0x28] sm:$0xff]   ;;  %v698_v26 = vld [vmem:[%s1092_s5 + $0x30] sm:$0xff]   ;;  %s809_s3 = smov 120  }
  0x1b   :  { %177 = vmatprep.subr.bf16.mxu0 %v806_v1  ;;  %v44_v21 = vld [vmem:[%s1087_s0] sm:$0xff]  ;;  %v161_v22 = vsel %vm159_vm1, %v691_v20, 0  ;;  %v699_v27 = vld [vmem:[%s1092_s5 + $0x38] sm:$0xff]   ;;  %s566_s16 = sshll.u32 %s810_s15, 4  ;;  %s567_s16 = int_to_ptr.vmem [resolvable:$true] %s566_s16 }
  0x1c   :  { %v46_v23 = vpack.c.bf16 %v44_v21, %v44_v21  ;;  %v696_v24 = vld [vmem:[%s1092_s5 + $0x20] sm:$0xff]   ;;  %v705_v40 = vld [vmem:[%s1096_s9 + $0x14] ss:$8 sps:$4 sm:$0xff]   ;;  %v703_v42 = vld [vmem:[%s1096_s9 + $0x10] ss:$8 sps:$4 sm:$0xff]   ;;  %s736_s17 = scalar_lea.vmem %s567_s16, 128  ;;  %p741_p1 = scmp.lt.s32.totalorder %s567_s16, %s567_s16 }
  0x1d   :  { %655 = vmatpush3.bf16.msra.mxu1 %v696_v24  ;;  %v591_v28 = vld [vmem:[%s1091_s4] ss:$0 sm:$0xff]  ;;  %v702_v39 = vld [vmem:[%s1096_s9 + $0x4] ss:$8 sps:$4 sm:$0xff]   ;;  %v711_v50 = vld [vmem:[%s1096_s9 + $0x34] ss:$8 sps:$4 sm:$0xff]   ;;  %p737_p0 = scmp.ne.s32.totalorder %s567_s16, %s736_s17  ;;  %p742_p2 = scmp.lt.s32.totalorder %s736_s17, %s736_s17 }
  0x1e   :  { %178 = vmatpush1.bf16.msra.mxu0 %v686_v15  ;;  %656 = vmatprep.subr.bf16.mxu1 %v807_v3  ;;  %v327_v36 = vld [vmem:[%s1094_s7] sm:$0xf]  ;;  %v708_v44 = vld [vmem:[%s1096_s9 + $0x24] ss:$8 sps:$4 sm:$0xff]   ;;  %v709_v51 = vld [vmem:[%s1096_s9 + $0x30] ss:$8 sps:$4 sm:$0xff]  }
  0x1f   :  { %179 = vmatprep.subr.bf16.mxu0 %v806_v1  ;;  %v341_v37 = vsel %vm339_vm3, %v327_v36, 0  ;;  %v700_v38 = vld [vmem:[%s1096_s9] ss:$8 sps:$4 sm:$0xff]   ;;  %v714_v60 = vld [vmem:[%s1096_s9 + $0x44] ss:$8 sps:$4 sm:$0xff]   ;;  %p743_p3 = por %p742_p2, %p741_p1 }
  0x20   :  { %v606_v41 = vld [vmem:[%s1093_s6] ss:$0 sm:$0xff]  ;;  %v717_v62 = vld [vmem:[%s1096_s9 + $0x54] ss:$8 sps:$4 sm:$0xff]   ;;  %v715_v63 = vld [vmem:[%s1096_s9 + $0x50] ss:$8 sps:$4 sm:$0xff]  }
  0x21   :  { %657 = vmatpush3.bf16.msra.mxu1 %v697_v25  ;;  %v706_v49 = vld [vmem:[%s1096_s9 + $0x20] ss:$8 sps:$4 sm:$0xff]   ;;  %v720_v0 = vld [vmem:[%s1096_s9 + $0x64] ss:$8 sps:$4 sm:$0xff]   ;;  %v723_v2 = vld [vmem:[%s1096_s9 + $0x74] ss:$8 sps:$4 sm:$0xff]   ;;  %p744_p4 = pnand %p743_p3, %p737_p0 }
  0x22   :  { %180 = vmatpush1.bf16.msra.mxu0 %v687_v16  ;;  %658 = vmatprep.subr.bf16.mxu1 %v807_v3  ;;  %v316_v52 = vld [vmem:[%s1088_s1] sm:$0xff] }
  0x23   :  { %181 = vmatprep.subr.bf16.mxu0 %v806_v1  ;;  %v317_v53 = vld [vmem:[%s1089_s2] sm:$0xff] }
  0x24   :  { %v318_v54 = vadd.f32 %v317_v53, %v316_v52  ;;  %v712_v61 = vld [vmem:[%s1096_s9 + $0x40] ss:$8 sps:$4 sm:$0xff]  }
  0x25   :  { %659 = vmatpush3.bf16.msra.mxu1 %v698_v26  ;;  %v615_v4 = vld [vmem:[%s1095_s8] ss:$0 sm:$0xff] }
  0x26   :  { %182 = vmatpush1.bf16.msra.mxu0 %v688_v17  ;;  %660 = vmatprep.subr.bf16.mxu1 %v807_v3  ;;  %v319_v55 = vmul.f32 0.5, %v318_v54 }
  0x27   :  { %183 = vmatprep.subr.bf16.mxu0 %v806_v1 }
  0x29   :  { %661 = vmatpush3.bf16.msra.mxu1 %v699_v27 }
  0x2a   :  { %184 = vmatpush1.bf16.msra.mxu0 %v689_v18  ;;  %493 = vmatprep.subr.bf16.mxu1 %v702_v39 }
  0x2b   :  { %185 = vmatprep.subr.bf16.mxu0 %v806_v1 }
  0x2e   :  { %186 = vmatpush1.bf16.msra.mxu0 %v690_v19 }
  0x2f   :  { %187 = vmatprep.subr.bf16.mxu0 %v806_v1 }
  0x32   :  { %188 = vmatpush1.bf16.msra.mxu0 %v161_v22 }
  0x33   :  { %666 = vmatprep.subr.bf16.mxu0 %v807_v3 }
  0x35   :  { %196 = vmatmul.mubr.bf16.vlgmr.msra.gmra.mrb[0].mxu0 %v46_v23 }
  0x36   :  { %668 = vmatprep.mubr.msk.bf16.mxu0 %vm808_vm2, %v807_v3  ;;  %667 = vmatpush3.bf16.msra.mxu0 %v341_v37  ;;  %v721_v3 = vld [vmem:[%s1096_s9 + $0x70] ss:$8 sps:$4 sm:$0xff]  }
 0x108   :  { %v197_v29 = vpop.f32.mrb[0].mxu0 }
 0x109   :  { %v198_v30 = vadd.f32 %v591_v28, %v197_v29  ;;  %v199_v31 = vpop.f32.mrb[1].mxu0 }
 0x10a   :  { %v200_v32 = vpop.f32.mrb[2].mxu0 }
 0x10b   :  { %724 = vtanh.f32 %v198_v30  ;;  %v201_v33 = vpop.f32.mrb[3].mxu0 }
 0x115   :  { %v725_v34 = vpop.eup %724 }
 0x116   :  { %v204_v35 = vpack.c.bf16 %v725_v34, %v725_v34 }
 0x118   :  { %663 = vmatmul.mubr.bf16.vlgmr.msra.gmra.mrb[0].mxu1 %v204_v35 }
 0x119   :  { %525 = vmatprep.mubr.bf16.mxu1 %v806_v1  ;;  %494 = vmatpush1.bf16.msra.mxu1 %v700_v38  ;;  %v718_v1 = vld [vmem:[%s1096_s9 + $0x60] ss:$8 sps:$4 sm:$0xff]  }
 0x11a   :  { %495 = vmatprep.subr.bf16.mxu1 %v705_v40 }
 0x11d   :  { %496 = vmatpush1.bf16.msra.mxu1 %v703_v42 }
 0x11e   :  { %497 = vmatprep.subr.bf16.mxu1 %v708_v44 }
 0x121   :  { %498 = vmatpush1.bf16.msra.mxu1 %v706_v49 }
 0x122   :  { %499 = vmatprep.subr.bf16.mxu1 %v711_v50 }
 0x125   :  { %500 = vmatpush1.bf16.msra.mxu1 %v709_v51 }
 0x126   :  { %501 = vmatprep.subr.bf16.mxu1 %v714_v60 }
 0x129   :  { %502 = vmatpush1.bf16.msra.mxu1 %v712_v61 }
 0x12a   :  { %503 = vmatprep.subr.bf16.mxu1 %v717_v62 }
 0x12d   :  { %504 = vmatpush1.bf16.msra.mxu1 %v715_v63 }
 0x12e   :  { %505 = vmatprep.subr.bf16.mxu1 %v720_v0 }
 0x131   :  { %506 = vmatpush1.bf16.msra.mxu1 %v718_v1 }
 0x132   :  { %507 = vmatprep.subr.bf16.mxu1 %v723_v2 }
 0x135   :  { %508 = vmatpush1.bf16.msra.mxu1 %v721_v3 }
 0x1eb   :  { %v310_v43 = vpop.f32.mrb[0].mxu1 }
 0x1ec   :  { %v311_v45 = vadd.f32 %v606_v41, %v310_v43  ;;  %v664_v46 = vpop.f32.mrb[1].mxu1 }
 0x1ed   :  { %v313_v47 = vpop.f32.mrb[2].mxu1 }
 0x1ee   :  { %v665_v48 = vpop.f32.mrb[3].mxu1  ;;  %321 = vrot.lane.b32.xlu0 %v311_v45, %s809_s3  ;;  %548 = vst.msk [vmem:[#allocation4] sm:$0xff] %vm335_vm4, %v311_v45 }
 0x260   :  { %v322_v56 = vpop.permute.xlu0 %321 }
 0x261   :  { %v324_v57 = vmul.f32 %v322_v56, %v319_v55  ;;  %549 = vst.msk [vmem:[#allocation6] sm:$0xff] %vm335_vm4, %v322_v56 }
 0x263   :  { %v325_v58 = vadd.f32 %v324_v57, %v311_v45 }
 0x265   :  { %v326_v59 = vpack.c.bf16 %v325_v58, %v325_v58 }
 0x267   :  { %669 = vmatmul.mubr.msk.bf16.vlgmr.msra.gmra.mrb[4].mxu0 %vm335_vm4, %v326_v59 }
 0x33a   :  { %v377_v5 = vpop.f32.mrb[4].mxu0 }
 0x33b   :  { %v378_v6 = vadd.f32 %v615_v4, %v377_v5  ;;  %v670_v7 = vpop.f32.mrb[5].mxu0 }
 0x33c   :  { %v380_v8 = vpop.f32.mrb[6].mxu0 }
 0x33d   :  { %726 = vtanh.f32 %v378_v6  ;;  %v671_v9 = vpop.f32.mrb[7].mxu0 }
 0x347   :  { %v727_v10 = vpop.eup %726 }
 0x348   :  { %v384_v11 = vpack.c.bf16 %v727_v10, %v727_v10 }
 0x34a   :  { %526 = vmatmul.mubr.bf16.vlgmr.msra.gmra.mrb[4].mxu1 %v384_v11 }
 0x34b   :  { %747 = shalt.err (!%p744_p4)
}
 0x34c   :  { %s748_s18 = scalar_lea.hbm %s1099_s12, 128 }
 0x34d   :  { %p749_p5 = scmp.ne.s32.totalorder %s1099_s12, %s748_s18  ;;  %p752_p6 = scmp.lt.u32.totalorder %s748_s18, %s1099_s12 }
 0x34f   :  { %p754_p7 = pnand %p752_p6, %p749_p5 }
 0x351   :  { %757 = shalt.err (!%p754_p7)
}
 0x352   :  { %569 = dma.vmem_to_hbm [thread:$0]  %s567_s16, 128, %s1099_s12, [#allocation5]  }
 0x353   :  { %s811_s1 = smov [#allocation6]  }
 0x354   :  { %s576_s2 = sshll.u32 %s811_s1, 4  ;;  %s577_s2 = int_to_ptr.vmem [resolvable:$true] %s576_s2 }
 0x355   :  { %s758_s23 = scalar_lea.vmem %s577_s2, 128  ;;  %p763_p9 = scmp.lt.s32.totalorder %s577_s2, %s577_s2 }
 0x356   :  { %p759_p8 = scmp.ne.s32.totalorder %s577_s2, %s758_s23  ;;  %p764_p10 = scmp.lt.s32.totalorder %s758_s23, %s758_s23 }
 0x358   :  { %p765_p11 = por %p764_p10, %p763_p9 }
 0x35a   :  { %p766_p12 = pnand %p765_p11, %p759_p8 }
 0x35c   :  { %769 = shalt.err (!%p766_p12)
}
 0x35d   :  { %s770_s26 = scalar_lea.hbm %s1100_s13, 128 }
 0x35e   :  { %p771_p13 = scmp.ne.s32.totalorder %s1100_s13, %s770_s26  ;;  %p774_p0 = scmp.lt.u32.totalorder %s770_s26, %s1100_s13 }
 0x360   :  { %p776_p1 = pnand %p774_p0, %p771_p13 }
 0x362   :  { %779 = shalt.err (!%p776_p1)
}
 0x363   :  { %579 = dma.vmem_to_hbm [thread:$0]  %s577_s2, 128, %s1100_s13, [#allocation5]   ;;  %v403_v12 = vlaneseq  ;;  %v401_v15 = vld [vmem:[%s1097_s10] sm:$0x3] }
 0x364   :  { %s812_s10 = smov [#allocation2]  }
 0x365   :  { %v404_v13 = vshrl.u32 %v403_v12, 7  ;;  %s556_s13 = sshll.u32 %s812_s10, 4  ;;  %s557_s13 = int_to_ptr.vmem [resolvable:$true] %s556_s13 }
 0x366   :  { %s780_s14 = scalar_lea.vmem %s557_s13, 256  ;;  %p785_p3 = scmp.lt.s32.totalorder %s557_s13, %s557_s13 }
 0x367   :  { %v405_v14 = vsub.s32 0, %v404_v13  ;;  %v409_v16 = vsub.s32 1, %v404_v13  ;;  %p781_p2 = scmp.ne.s32.totalorder %s557_s13, %s780_s14  ;;  %p786_p4 = scmp.lt.s32.totalorder %s780_s14, %s780_s14 }
 0x369   :  { %v406_v17 = vrot.slane %v401_v15, %v405_v14  ;;  %v410_v18 = vrot.slane %v401_v15, %v409_v16  ;;  %p787_p5 = por %p786_p4, %p785_p3 }
 0x36b   :  { %p788_p6 = pnand %p787_p5, %p781_p2 }
 0x41d   :  { %v527_v19 = vpop.f32.mrb[4].mxu1 }
 0x41e   :  { %v528_v20 = vadd.f32 %v527_v19, %v406_v17  ;;  %v529_v21 = vpop.f32.mrb[5].mxu1 }
 0x41f   :  { %v530_v22 = vadd.f32 %v529_v21, %v410_v18  ;;  %v531_v23 = vpop.f32.mrb[6].mxu1 }
 0x420   :  { %v633_v24 = vmul.f32 -1.442695, %v528_v20  ;;  %v532_v25 = vpop.f32.mrb[7].mxu1 }
 0x421   :  { %v634_v26 = vmul.f32 -1.442695, %v530_v22 }
 0x422   :  { %728 = vpow2.f32 %v633_v24 }
 0x423   :  { %730 = vpow2.f32 %v634_v26 }
 0x42c   :  { %v729_v27 = vpop.eup %728 }
 0x42d   :  { %v731_v28 = vpop.eup %730  ;;  %v540_v29 = vadd.f32 1.0, %v729_v27 }
 0x42e   :  { %v541_v30 = vadd.f32 1.0, %v731_v28 }
 0x42f   :  { %732 = vrcp.f32 %v540_v29 }
 0x430   :  { %734 = vrcp.f32 %v541_v30 }
 0x439   :  { %v733_v31 = vpop.eup %732 }
 0x43a   :  { %v735_v32 = vpop.eup %734  ;;  %546 = vst [vmem:[#allocation2] sm:$0xff] %v733_v31 }
 0x43b   :  { %547 = vst.msk [vmem:[#allocation2 + $0x8] sm:$0xff] %vm155_vm0, %v735_v32 }
 0x43c   :  { %791 = shalt.err (!%p788_p6)
}
 0x43d   :  { %s792_s16 = scalar_lea.hbm %s1098_s11, 256 }
 0x43e   :  { %p793_p7 = scmp.ne.s32.totalorder %s1098_s11, %s792_s16  ;;  %p796_p8 = scmp.lt.u32.totalorder %s792_s16, %s1098_s11 }
 0x440   :  { %p798_p9 = pnand %p796_p8, %p793_p7 }
 0x442   :  { %801 = shalt.err (!%p798_p9)
}
 0x443   :  { %559 = dma.vmem_to_hbm [thread:$0]  %s557_s13, 256, %s1098_s11, [#allocation3]  }
 0x444   :  { %802 = dma.done.wait [#allocation3], 256  }
 0x445   :  { %803 = vsyncadd [#allocation3], 4294967040 }
 0x446   :  { %804 = dma.done.wait [#allocation5], 256  }
 0x447   :  { %805 = vsyncadd [#allocation5], 4294967040 }
 0x448   :  { %589 = vsyncpa [#allocation3], 1 }
 0x449   :  { %590 = vsyncpa [#allocation5], 1 }

</bundles_post_ra>
